<compile_context>
chip_gen: v5e
topology: v5e:2x2
jax: 0.10.0
libtpu: 0.0.40
codegen_flags: <defaults>
</compile_context>

<pallas_src>
import jax
import jax.numpy as jnp
import numpy as np
from jax.experimental import pallas as pl
from jax.experimental.pallas import tpu as pltpu


def _sigmoid(v):
    # tanh-form logistic: one EUP op, numerically safe for large |v|.
    return 0.5 * jnp.tanh(0.5 * v) + 0.5


# ------------------------------ fused kernel ------------------------------- #
def fused_decoder_kernel(
        # per-batch inputs
        lens_ref,        # (B, 1)  int32  valid source length per row
        cov_ref,         # (B, S)  f32    coverage vector
        enc_ref,         # (B, S, H)      encoder outputs
        emb_ref,         # (B, E)         decoder-token embeddings
        h_ref,           # (B, H)         previous decoder hidden state
        dec_bias_ref,    # (B, H)         hoisted  emb @ W_s + b_att_lin
        # attention weights
        w_enc_ref,       # (H, H)         encoder rows of the attention Linear
        w_cov_sum_ref,   # (1, H)         colsum of the coverage rows (rank-1 term)
        w_v_ref,         # (1, H)         attention v
        b_v_ref,         # (1, 1)
        # GRU weights, gates (r,z,n) stacked along the lane axis -> 3H
        w_gi_e_ref,      # (E, 3H)
        w_gi_c_ref,      # (H, 3H)
        w_gh_ref,        # (H, 3H)
        b_gi_ref,        # (1, 3H)
        b_gh_ref,        # (1, 3H)
        # vocab projection + pointer gate
        wo_h_ref, wo_c_ref, wo_e_ref, b_out_ref,   # (H,V) (H,V) (E,V) (1,V)
        wg_h_ref, wg_c_ref, wg_e_ref, b_g_ref,     # (1,H) (1,H) (1,E) (1,1)
        # outputs
        logits_ref,      # (B, V)
        h_new_ref,       # (B, H)
        attn_ref,        # (B, S)
        p_gen_ref,       # (B, 1)
        cov_out_ref,     # (B, S)
):
    bt, seq = attn_ref.shape
    hidden = h_ref.shape[-1]

    # ------------- coverage attention (batched, lane-dense in S) ------------- #
    enc3 = enc_ref[...]                                    # (B, S, H)
    cov = cov_ref[...]                                     # (B, S)

    # One MXU matmul for the whole batch tile: (B*S, H) @ (H, H).
    enc2 = enc3.reshape(bt * seq, hidden)
    pre = jnp.dot(enc2, w_enc_ref[...],
                  preferred_element_type=jnp.float32).reshape(bt, seq, hidden)
    # hoisted decoder-state bias + rank-1 coverage term (colsum of W_cov)
    pre = pre + dec_bias_ref[...][:, None, :]
    pre = pre + cov[:, :, None] * w_cov_sum_ref[...][None, :, :]
    x = jnp.tanh(pre)                                      # (B, S, H)

    # v-projection: VPU multiply + lane reduce (no degenerate MXU matvec)
    att = jnp.sum(x * w_v_ref[...][None, :, :], axis=2) + b_v_ref[...]   # (B, S)

    # length mask: large finite negative keeps fully-masked rows NaN-free
    pos = jax.lax.broadcasted_iota(jnp.int32, (bt, seq), 1)
    att = jnp.where(pos >= lens_ref[...], -1e30, att)

    # numerically-stable softmax along the lane axis S
    m = jnp.max(att, axis=1, keepdims=True)
    e = jnp.exp(att - m)
    denom = jnp.sum(e, axis=1, keepdims=True)
    # exact reciprocal keeps the 1e-4 check tight; approx=True (EUP slot) is a
    # drop-in for production where ~1e-3 accuracy is acceptable.
    attn = e * pl.reciprocal(denom)

    attn_ref[...] = attn                                   # dense (B, S) stores
    cov_out_ref[...] = cov + attn

    # fused context (the torch.bmm): (B,1,S) @ (B,S,H) -> (B,H); stays in vregs
    ctx = jnp.einsum("bqs,bsh->bqh", attn[:, None, :], enc3,
                     preferred_element_type=jnp.float32).reshape(bt, hidden)

    # ------------------ GRU cell: 3 fused gate matmuls (not 9) --------------- #
    emb = emb_ref[...]
    h = h_ref[...]
    gi = (jnp.dot(emb, w_gi_e_ref[...], preferred_element_type=jnp.float32)
          + jnp.dot(ctx, w_gi_c_ref[...], preferred_element_type=jnp.float32)
          + b_gi_ref[...])                                 # (B, 3H)
    gh = (jnp.dot(h, w_gh_ref[...], preferred_element_type=jnp.float32)
          + b_gh_ref[...])                                 # (B, 3H)

    r = _sigmoid(gi[:, :hidden] + gh[:, :hidden])
    z = _sigmoid(gi[:, hidden:2 * hidden] + gh[:, hidden:2 * hidden])
    n = jnp.tanh(gi[:, 2 * hidden:] + r * gh[:, 2 * hidden:])
    h_new = (1.0 - z) * n + z * h
    h_new_ref[...] = h_new

    # ------------------ vocab projection + pointer gate ---------------------- #
    # TODO(synk): for a real vocabulary (V >= ~16k) give this a "parallel" vocab-tile
    # grid axis (TV multiple of 128) and compute the attention/GRU section only on
    # the first V step (pl.when) into VMEM scratch.
    logits_ref[...] = (
        jnp.dot(h_new, wo_h_ref[...], preferred_element_type=jnp.float32)
        + jnp.dot(ctx, wo_c_ref[...], preferred_element_type=jnp.float32)
        + jnp.dot(emb, wo_e_ref[...], preferred_element_type=jnp.float32)
        + b_out_ref[...])

    # pointer gate on VPU + XLU: p_gen = sigmoid(w_gen . cat([h', c, emb]) + b)
    p_lin = (jnp.sum(h_new * wg_h_ref[...], axis=1, keepdims=True)
             + jnp.sum(ctx * wg_c_ref[...], axis=1, keepdims=True)
             + jnp.sum(emb * wg_e_ref[...], axis=1, keepdims=True)
             + b_g_ref[...])
    p_gen_ref[...] = _sigmoid(p_lin)


# --------------------------------- wrapper ---------------------------------- #
def decoder_forward(params, token_ids, prev_hidden, enc_output, text_lengths,
                    coverage_vector):
    B, S, H = enc_output.shape
    V = params["out_b"].shape[0]
    # TODO(synk): the embedding row gather stays as one XLA gather (jnp.take); a
    # Pallas gather (scalar prefetch + pl.Element) buys nothing at E=16.
    emb = jnp.take(params["embedding"], token_ids, axis=0)            # (B, E)
    E = emb.shape[-1]

    # ---- host-side prep (folds into constants / tiny ops under jit) ----
    w_lin = params["w_att_lin"]                  # (2H+E, H): rows [enc | s | cov]
    w_enc = w_lin[:H]                                                  # (H, H)
    w_s = w_lin[H:H + E]                                               # (E, H)
    w_cov_sum = jnp.sum(w_lin[H + E:], axis=0).reshape(1, H)           # rank-1 term
    dec_bias = emb @ w_s + params["b_att_lin"]                         # (B, H)

    # GRU gate weights stacked along lanes -> 3 in-kernel matmuls instead of 9
    w_gi_e = jnp.concatenate([params["gru_w_ie"][k] for k in range(3)], axis=1)  # (E,3H)
    w_gi_c = jnp.concatenate([params["gru_w_ic"][k] for k in range(3)], axis=1)  # (H,3H)
    w_gh = jnp.concatenate([params["gru_w_hh"][k] for k in range(3)], axis=1)    # (H,3H)
    b_gi = jnp.concatenate([params["gru_b_i"][k] for k in range(3)], axis=1)     # (1,3H)
    b_gh = jnp.concatenate([params["gru_b_h"][k] for k in range(3)], axis=1)     # (1,3H)

    lens2d = text_lengths.astype(jnp.int32).reshape(B, 1)
    cov = coverage_vector.astype(jnp.float32)

    # Single fused kernel call (whole decode-step batch in one block): ctx, h' and
    # the GRU activations never round-trip HBM and there is exactly one launch.
    #
    # Production notes (not needed at these demo shapes):
    #  * large B: add a batch-tile grid axis (BT >= 8, a sublane multiple) marked
    #    "parallel" so v7x's two TensorCores each take tiles; block every (B, ...)
    #    operand with lambda i: (i, 0, ...).
    #  * real vocab: add a second "parallel" vocab-tile axis (see TODO in kernel)
    #    so the (H,V) weights stream through VMEM instead of living there.
    #  * v6e/v7x: cast enc_output and out_w_* to bf16 at this boundary (keep
    #    preferred_element_type=f32 accumulation and f32 tanh/exp/softmax; on v5e
    #    keep all VPU/EUP math in f32) to halve the dominant DMA bytes.  Left in
    #    f32 here so the 1e-4 reference check stays tight.
    #  * in-place coverage: add input_output_aliases={1: 4} (cov input -> coverage
    #    output) when the caller donates the coverage buffer.
    out_shapes = (jax.ShapeDtypeStruct((B, V), jnp.float32),   # logits
                  jax.ShapeDtypeStruct((B, H), jnp.float32),   # new hidden
                  jax.ShapeDtypeStruct((B, S), jnp.float32),   # attention weights
                  jax.ShapeDtypeStruct((B, 1), jnp.float32),   # p_gen
                  jax.ShapeDtypeStruct((B, S), jnp.float32))   # new coverage

    logits, h_new, attn, p_gen, new_cov = pl.pallas_call(
        fused_decoder_kernel,
        out_shape=out_shapes,
        compiler_params=pltpu.CompilerParams(vmem_limit_bytes=32 * 1024 * 1024),
    )(lens2d, cov, enc_output, emb, prev_hidden, dec_bias,
      w_enc, w_cov_sum, params["w_att_v"].reshape(1, H),
      params["b_att_v"].reshape(1, 1),
      w_gi_e, w_gi_c, w_gh, b_gi, b_gh,
      params["out_w_h"], params["out_w_c"], params["out_w_e"],
      params["out_b"].reshape(1, V),
      params["gen_w_h"], params["gen_w_c"], params["gen_w_e"],
      params["gen_b"].reshape(1, 1))

    # NOTE: nn.Dropout is declared in the torch module but never applied in forward().
    return logits, h_new, attn, p_gen, new_cov


# ------------------------------ pure-JAX reference --------------------------- #
def decoder_reference(params, token_ids, prev_hidden, enc_output, text_lengths,
                      coverage_vector):
    B, S, H = enc_output.shape
    emb = jnp.take(params["embedding"], token_ids, axis=0)
    E = emb.shape[-1]

    # attention (concat form, matches the kernel's split decomposition exactly)
    s = jnp.broadcast_to(emb[:, None, :], (B, S, E))
    cov_copy = jnp.broadcast_to(coverage_vector[..., None], (B, S, H))
    cat = jnp.concatenate([enc_output, s, cov_copy], axis=2)
    x = jnp.tanh(cat @ params["w_att_lin"] + params["b_att_lin"])
    att = (x @ params["w_att_v"])[..., 0] + params["b_att_v"][0]
    mask = jnp.arange(S)[None, :] >= text_lengths[:, None]
    att = jnp.where(mask, -1e30, att)
    attn = jax.nn.softmax(att, axis=-1)
    new_cov = coverage_vector + attn
    c = jnp.einsum("bs,bsh->bh", attn, enc_output)

    # GRU cell (PyTorch gate order r, z, n; input = cat([emb, c]))
    w_ie, w_ic, w_hh = params["gru_w_ie"], params["gru_w_ic"], params["gru_w_hh"]
    b_i, b_h = params["gru_b_i"], params["gru_b_h"]
    h = prev_hidden

    def gi(k):
        return emb @ w_ie[k] + c @ w_ic[k] + b_i[k]

    def gh(k):
        return h @ w_hh[k] + b_h[k]

    r = jax.nn.sigmoid(gi(0) + gh(0))
    z = jax.nn.sigmoid(gi(1) + gh(1))
    n = jnp.tanh(gi(2) + r * gh(2))
    h_new = (1.0 - z) * n + z * h

    logits = (h_new @ params["out_w_h"] + c @ params["out_w_c"]
              + emb @ params["out_w_e"] + params["out_b"])
    p_gen = jax.nn.sigmoid(
        jnp.sum(h_new * params["gen_w_h"], axis=-1, keepdims=True)
        + jnp.sum(c * params["gen_w_c"], axis=-1, keepdims=True)
        + jnp.sum(emb * params["gen_w_e"], axis=-1, keepdims=True)
        + params["gen_b"])
    return logits, h_new, attn, p_gen, new_cov


# ------------------------------------ main ----------------------------------- #
if __name__ == "__main__":
    # small config: batch=2, seq=8, hidden=32, emb=16, vocab=64, PAD token id = 0
    B, S, H, E, V = 2, 8, 32, 16, 64
    key = jax.random.PRNGKey(0)
    ks = jax.random.split(key, 21)

    def unif(k, shape, fan_in):
        b = 1.0 / np.sqrt(fan_in)
        return jax.random.uniform(k, shape, jnp.float32, -b, b)

    params = {
        # embedding (padding_idx=0 row zeroed, as in nn.Embedding(padding_idx=...))
        "embedding": unif(ks[0], (V, E), E).at[0].set(0.0),
        # attention: Linear(2H+E -> H) over cat([enc, s, cov_copy]), v: Linear(H -> 1)
        "w_att_lin": unif(ks[1], (2 * H + E, H), 2 * H + E),
        "b_att_lin": unif(ks[2], (H,), 2 * H + E),
        "w_att_v":   unif(ks[3], (H, 1), H),
        "b_att_v":   unif(ks[4], (1,), H),
        # GRU(E+H -> H), gate order (r, z, n), input concat order [emb, c]
        "gru_w_ie": unif(ks[5], (3, E, H), E + H),
        "gru_w_ic": unif(ks[6], (3, H, H), E + H),
        "gru_w_hh": unif(ks[7], (3, H, H), H),
        "gru_b_i":  unif(ks[8], (3, 1, H), H),
        "gru_b_h":  unif(ks[9], (3, 1, H), H),
        # output Linear(2H+E -> V) over cat([h', c, emb])
        "out_w_h": unif(ks[10], (H, V), 2 * H + E),
        "out_w_c": unif(ks[11], (H, V), 2 * H + E),
        "out_w_e": unif(ks[12], (E, V), 2 * H + E),
        "out_b":   unif(ks[13], (V,), 2 * H + E),
        # pointer gate Linear(2H+E -> 1) over cat([h', c, emb])
        "gen_w_h": unif(ks[14], (1, H), 2 * H + E),
        "gen_w_c": unif(ks[15], (1, H), 2 * H + E),
        "gen_w_e": unif(ks[16], (1, E), 2 * H + E),
        "gen_b":   unif(ks[17], (1,), 2 * H + E),
    }

    token_ids = jnp.array([3, 0], dtype=jnp.int32)          # second token is PAD
    prev_hidden = jax.random.normal(ks[18], (B, H), jnp.float32)
    enc_output = jax.random.normal(ks[19], (B, S, H), jnp.float32)
    coverage_vector = jax.random.uniform(ks[20], (B, S), jnp.float32)
    text_lengths = jnp.array([S, 5], dtype=jnp.int32)

    fwd = jax.jit(decoder_forward)
    outs = fwd(params, token_ids, prev_hidden, enc_output, text_lengths,
               coverage_vector)
    jax.block_until_ready(outs)

    refs = decoder_reference(params, token_ids, prev_hidden, enc_output,
                             text_lengths, coverage_vector)

    names = ("dec_output", "dec_hidden", "attention_weights", "p_gen", "coverage")
    for name, got, want in zip(names, outs, refs):
        np.testing.assert_allclose(np.asarray(got), np.asarray(want),
                                   rtol=1e-4, atol=1e-4, err_msg=name)
    print("KERNEL_OK")
</pallas_src>

<mosaic_0001>
module attributes {stable_mosaic.version = 11 : i64} {
  func.func @fused_decoder_kernel(%arg0: memref<2x1xi32, #tpu.memory_space<vmem>>, %arg1: memref<2x8xf32, #tpu.memory_space<vmem>>, %arg2: memref<2x8x32xf32, #tpu.memory_space<vmem>>, %arg3: memref<2x16xf32, #tpu.memory_space<vmem>>, %arg4: memref<2x32xf32, #tpu.memory_space<vmem>>, %arg5: memref<2x32xf32, #tpu.memory_space<vmem>>, %arg6: memref<32x32xf32, #tpu.memory_space<vmem>>, %arg7: memref<1x32xf32, #tpu.memory_space<vmem>>, %arg8: memref<1x32xf32, #tpu.memory_space<vmem>>, %arg9: memref<1x1xf32, #tpu.memory_space<vmem>>, %arg10: memref<16x96xf32, #tpu.memory_space<vmem>>, %arg11: memref<32x96xf32, #tpu.memory_space<vmem>>, %arg12: memref<32x96xf32, #tpu.memory_space<vmem>>, %arg13: memref<1x96xf32, #tpu.memory_space<vmem>>, %arg14: memref<1x96xf32, #tpu.memory_space<vmem>>, %arg15: memref<32x64xf32, #tpu.memory_space<vmem>>, %arg16: memref<32x64xf32, #tpu.memory_space<vmem>>, %arg17: memref<16x64xf32, #tpu.memory_space<vmem>>, %arg18: memref<1x64xf32, #tpu.memory_space<vmem>>, %arg19: memref<1x32xf32, #tpu.memory_space<vmem>>, %arg20: memref<1x32xf32, #tpu.memory_space<vmem>>, %arg21: memref<1x16xf32, #tpu.memory_space<vmem>>, %arg22: memref<1x1xf32, #tpu.memory_space<vmem>>, %arg23: memref<2x64xf32, #tpu.memory_space<vmem>>, %arg24: memref<2x32xf32, #tpu.memory_space<vmem>>, %arg25: memref<2x8xf32, #tpu.memory_space<vmem>>, %arg26: memref<2x1xf32, #tpu.memory_space<vmem>>, %arg27: memref<2x8xf32, #tpu.memory_space<vmem>>) attributes {dimension_semantics = [], scalar_prefetch = 0 : i64, scratch_operands = 0 : i64, tpu.core_type = #tpu.core_type<tc>} {
    %c0 = arith.constant 0 : index
    %c0_0 = arith.constant 0 : index
    %c0_1 = arith.constant 0 : index
    %0 = vector.load %arg2[%c0, %c0_0, %c0_1] : memref<2x8x32xf32, #tpu.memory_space<vmem>>, vector<2x8x32xf32>
    %c0_2 = arith.constant 0 : index
    %c0_3 = arith.constant 0 : index
    %1 = vector.load %arg1[%c0_2, %c0_3] : memref<2x8xf32, #tpu.memory_space<vmem>>, vector<2x8xf32>
    %2 = vector.shape_cast %0 : vector<2x8x32xf32> to vector<16x32xf32>
    %c0_4 = arith.constant 0 : index
    %c0_5 = arith.constant 0 : index
    %3 = vector.load %arg6[%c0_4, %c0_5] : memref<32x32xf32, #tpu.memory_space<vmem>>, vector<32x32xf32>
    %cst = arith.constant dense<0.000000e+00> : vector<16x32xf32>
    %4 = tpu.matmul %2, %3, %cst {dimension_numbers = #tpu.dot_dimension_numbers<[1], [0], [0], [1], [0, 0, 1, 1], [], []>} : vector<16x32xf32>, vector<32x32xf32>, vector<16x32xf32> -> vector<16x32xf32>
    %5 = vector.shape_cast %4 : vector<16x32xf32> to vector<2x8x32xf32>
    %c0_6 = arith.constant 0 : index
    %c0_7 = arith.constant 0 : index
    %6 = vector.load %arg5[%c0_6, %c0_7] : memref<2x32xf32, #tpu.memory_space<vmem>>, vector<2x32xf32>
    %7 = vector.shape_cast %6 : vector<2x32xf32> to vector<2x1x32xf32>
    %8 = vector.broadcast %7 : vector<2x1x32xf32> to vector<2x8x32xf32>
    %9 = arith.addf %5, %8 : vector<2x8x32xf32>
    %10 = vector.shape_cast %1 : vector<2x8xf32> to vector<2x8x1xf32>
    %c0_8 = arith.constant 0 : index
    %c0_9 = arith.constant 0 : index
    %11 = vector.load %arg7[%c0_8, %c0_9] : memref<1x32xf32, #tpu.memory_space<vmem>>, vector<1x32xf32>
    %12 = vector.shape_cast %11 : vector<1x32xf32> to vector<1x1x32xf32>
    %13 = vector.broadcast %10 : vector<2x8x1xf32> to vector<2x8x32xf32>
    %14 = vector.broadcast %12 : vector<1x1x32xf32> to vector<2x8x32xf32>
    %15 = arith.mulf %13, %14 : vector<2x8x32xf32>
    %16 = arith.addf %9, %15 : vector<2x8x32xf32>
    %17 = math.tanh %16 : vector<2x8x32xf32>
    %c0_10 = arith.constant 0 : index
    %c0_11 = arith.constant 0 : index
    %18 = vector.load %arg8[%c0_10, %c0_11] : memref<1x32xf32, #tpu.memory_space<vmem>>, vector<1x32xf32>
    %19 = vector.shape_cast %18 : vector<1x32xf32> to vector<1x1x32xf32>
    %20 = vector.broadcast %19 : vector<1x1x32xf32> to vector<2x8x32xf32>
    %21 = arith.mulf %17, %20 : vector<2x8x32xf32>
    %cst_12 = arith.constant dense<0.000000e+00> : vector<2x8xf32>
    %22 = vector.multi_reduction <add>, %21, %cst_12 [2] : vector<2x8x32xf32> to vector<2x8xf32>
    %c0_13 = arith.constant 0 : index
    %c0_14 = arith.constant 0 : index
    %23 = vector.load %arg9[%c0_13, %c0_14] : memref<1x1xf32, #tpu.memory_space<vmem>>, vector<1x1xf32>
    %24 = vector.broadcast %23 : vector<1x1xf32> to vector<2x8xf32>
    %25 = arith.addf %22, %24 : vector<2x8xf32>
    %26 = tpu.iota {dimensions = array<i32: 1>} : vector<2x8xi32>
    %c0_15 = arith.constant 0 : index
    %c0_16 = arith.constant 0 : index
    %27 = vector.load %arg0[%c0_15, %c0_16] : memref<2x1xi32, #tpu.memory_space<vmem>>, vector<2x1xi32>
    %28 = vector.broadcast %27 : vector<2x1xi32> to vector<2x8xi32>
    %29 = arith.cmpi sge, %26, %28 : vector<2x8xi32>
    %cst_17 = arith.constant -1.000000e+30 : f32
    %30 = vector.broadcast %cst_17 : f32 to vector<2x8xf32>
    %31 = arith.select %29, %30, %25 : vector<2x8xi1>, vector<2x8xf32>
    %cst_18 = arith.constant dense<0xFF800000> : vector<2xf32>
    %32 = vector.multi_reduction <maximumf>, %31, %cst_18 [1] : vector<2x8xf32> to vector<2xf32>
    %33 = vector.shape_cast %32 : vector<2xf32> to vector<2x1xf32>
    %34 = vector.broadcast %33 : vector<2x1xf32> to vector<2x8xf32>
    %35 = arith.subf %31, %34 : vector<2x8xf32>
    %36 = math.exp %35 : vector<2x8xf32>
    %cst_19 = arith.constant dense<0.000000e+00> : vector<2xf32>
    %37 = vector.multi_reduction <add>, %36, %cst_19 [1] : vector<2x8xf32> to vector<2xf32>
    %38 = vector.shape_cast %37 : vector<2xf32> to vector<2x1xf32>
    %39 = tpu.reciprocal %38 : vector<2x1xf32> -> vector<2x1xf32>
    %40 = vector.broadcast %39 : vector<2x1xf32> to vector<2x8xf32>
    %41 = arith.mulf %36, %40 : vector<2x8xf32>
    %c0_20 = arith.constant 0 : index
    %c0_21 = arith.constant 0 : index
    %42 = vector.load %arg25[%c0_20, %c0_21] : memref<2x8xf32, #tpu.memory_space<vmem>>, vector<2x8xf32>
    tpu.vector_store %arg25[%c0_20, %c0_21], %41 {strides = array<i32>} : memref<2x8xf32, #tpu.memory_space<vmem>>, vector<2x8xf32>,
    %43 = arith.addf %1, %41 : vector<2x8xf32>
    %c0_22 = arith.constant 0 : index
    %c0_23 = arith.constant 0 : index
    %44 = vector.load %arg27[%c0_22, %c0_23] : memref<2x8xf32, #tpu.memory_space<vmem>>, vector<2x8xf32>
    tpu.vector_store %arg27[%c0_22, %c0_23], %43 {strides = array<i32>} : memref<2x8xf32, #tpu.memory_space<vmem>>, vector<2x8xf32>,
    %45 = vector.shape_cast %41 : vector<2x8xf32> to vector<2x1x8xf32>
    "tpu.trace_start"() <{level = 10 : i32, message = "bqs,bsh->bqh"}> : () -> ()
    %cst_24 = arith.constant dense<0.000000e+00> : vector<2x1x32xf32>
    %46 = tpu.matmul %45, %0, %cst_24 {dimension_numbers = #tpu.dot_dimension_numbers<[2], [1], [1], [2], [0, 0, 0, 1, 1, 2], [0], [0]>} : vector<2x1x8xf32>, vector<2x8x32xf32>, vector<2x1x32xf32> -> vector<2x1x32xf32>
    "tpu.trace_stop"() : () -> ()
    %47 = vector.shape_cast %46 : vector<2x1x32xf32> to vector<2x32xf32>
    %c0_25 = arith.constant 0 : index
    %c0_26 = arith.constant 0 : index
    %48 = vector.load %arg3[%c0_25, %c0_26] : memref<2x16xf32, #tpu.memory_space<vmem>>, vector<2x16xf32>
    %c0_27 = arith.constant 0 : index
    %c0_28 = arith.constant 0 : index
    %49 = vector.load %arg4[%c0_27, %c0_28] : memref<2x32xf32, #tpu.memory_space<vmem>>, vector<2x32xf32>
    %c0_29 = arith.constant 0 : index
    %c0_30 = arith.constant 0 : index
    %50 = vector.load %arg10[%c0_29, %c0_30] : memref<16x96xf32, #tpu.memory_space<vmem>>, vector<16x96xf32>
    %cst_31 = arith.constant dense<0.000000e+00> : vector<2x96xf32>
    %51 = tpu.matmul %48, %50, %cst_31 {dimension_numbers = #tpu.dot_dimension_numbers<[1], [0], [0], [1], [0, 0, 1, 1], [], []>} : vector<2x16xf32>, vector<16x96xf32>, vector<2x96xf32> -> vector<2x96xf32>
    %c0_32 = arith.constant 0 : index
    %c0_33 = arith.constant 0 : index
    %52 = vector.load %arg11[%c0_32, %c0_33] : memref<32x96xf32, #tpu.memory_space<vmem>>, vector<32x96xf32>
    %cst_34 = arith.constant dense<0.000000e+00> : vector<2x96xf32>
    %53 = tpu.matmul %47, %52, %cst_34 {dimension_numbers = #tpu.dot_dimension_numbers<[1], [0], [0], [1], [0, 0, 1, 1], [], []>} : vector<2x32xf32>, vector<32x96xf32>, vector<2x96xf32> -> vector<2x96xf32>
    %54 = arith.addf %51, %53 : vector<2x96xf32>
    %c0_35 = arith.constant 0 : index
    %c0_36 = arith.constant 0 : index
    %55 = vector.load %arg13[%c0_35, %c0_36] : memref<1x96xf32, #tpu.memory_space<vmem>>, vector<1x96xf32>
    %56 = vector.broadcast %55 : vector<1x96xf32> to vector<2x96xf32>
    %57 = arith.addf %54, %56 : vector<2x96xf32>
    %c0_37 = arith.constant 0 : index
    %c0_38 = arith.constant 0 : index
    %58 = vector.load %arg12[%c0_37, %c0_38] : memref<32x96xf32, #tpu.memory_space<vmem>>, vector<32x96xf32>
    %cst_39 = arith.constant dense<0.000000e+00> : vector<2x96xf32>
    %59 = tpu.matmul %49, %58, %cst_39 {dimension_numbers = #tpu.dot_dimension_numbers<[1], [0], [0], [1], [0, 0, 1, 1], [], []>} : vector<2x32xf32>, vector<32x96xf32>, vector<2x96xf32> -> vector<2x96xf32>
    %c0_40 = arith.constant 0 : index
    %c0_41 = arith.constant 0 : index
    %60 = vector.load %arg14[%c0_40, %c0_41] : memref<1x96xf32, #tpu.memory_space<vmem>>, vector<1x96xf32>
    %61 = vector.broadcast %60 : vector<1x96xf32> to vector<2x96xf32>
    %62 = arith.addf %59, %61 : vector<2x96xf32>
    %63 = vector.extract_strided_slice %57 {offsets = [0, 0], sizes = [2, 32], strides = [1, 1]} : vector<2x96xf32> to vector<2x32xf32>
    %64 = vector.extract_strided_slice %62 {offsets = [0, 0], sizes = [2, 32], strides = [1, 1]} : vector<2x96xf32> to vector<2x32xf32>
    %65 = arith.addf %63, %64 : vector<2x32xf32>
    %cst_42 = arith.constant 5.000000e-01 : f32
    %66 = vector.broadcast %cst_42 : f32 to vector<2x32xf32>
    %67 = arith.mulf %66, %65 : vector<2x32xf32>
    %68 = math.tanh %67 : vector<2x32xf32>
    %cst_43 = arith.constant 5.000000e-01 : f32
    %69 = vector.broadcast %cst_43 : f32 to vector<2x32xf32>
    %70 = arith.mulf %69, %68 : vector<2x32xf32>
    %cst_44 = arith.constant 5.000000e-01 : f32
    %71 = vector.broadcast %cst_44 : f32 to vector<2x32xf32>
    %72 = arith.addf %70, %71 : vector<2x32xf32>
    %73 = vector.extract_strided_slice %57 {offsets = [0, 32], sizes = [2, 32], strides = [1, 1]} : vector<2x96xf32> to vector<2x32xf32>
    %74 = vector.extract_strided_slice %62 {offsets = [0, 32], sizes = [2, 32], strides = [1, 1]} : vector<2x96xf32> to vector<2x32xf32>
    %75 = arith.addf %73, %74 : vector<2x32xf32>
    %cst_45 = arith.constant 5.000000e-01 : f32
    %76 = vector.broadcast %cst_45 : f32 to vector<2x32xf32>
    %77 = arith.mulf %76, %75 : vector<2x32xf32>
    %78 = math.tanh %77 : vector<2x32xf32>
    %cst_46 = arith.constant 5.000000e-01 : f32
    %79 = vector.broadcast %cst_46 : f32 to vector<2x32xf32>
    %80 = arith.mulf %79, %78 : vector<2x32xf32>
    %cst_47 = arith.constant 5.000000e-01 : f32
    %81 = vector.broadcast %cst_47 : f32 to vector<2x32xf32>
    %82 = arith.addf %80, %81 : vector<2x32xf32>
    %83 = vector.extract_strided_slice %57 {offsets = [0, 64], sizes = [2, 32], strides = [1, 1]} : vector<2x96xf32> to vector<2x32xf32>
    %84 = vector.extract_strided_slice %62 {offsets = [0, 64], sizes = [2, 32], strides = [1, 1]} : vector<2x96xf32> to vector<2x32xf32>
    %85 = arith.mulf %72, %84 : vector<2x32xf32>
    %86 = arith.addf %83, %85 : vector<2x32xf32>
    %87 = math.tanh %86 : vector<2x32xf32>
    %cst_48 = arith.constant 1.000000e+00 : f32
    %88 = vector.broadcast %cst_48 : f32 to vector<2x32xf32>
    %89 = arith.subf %88, %82 : vector<2x32xf32>
    %90 = arith.mulf %89, %87 : vector<2x32xf32>
    %91 = arith.mulf %82, %49 : vector<2x32xf32>
    %92 = arith.addf %90, %91 : vector<2x32xf32>
    %c0_49 = arith.constant 0 : index
    %c0_50 = arith.constant 0 : index
    %93 = vector.load %arg24[%c0_49, %c0_50] : memref<2x32xf32, #tpu.memory_space<vmem>>, vector<2x32xf32>
    tpu.vector_store %arg24[%c0_49, %c0_50], %92 {strides = array<i32>} : memref<2x32xf32, #tpu.memory_space<vmem>>, vector<2x32xf32>,
    %c0_51 = arith.constant 0 : index
    %c0_52 = arith.constant 0 : index
    %94 = vector.load %arg15[%c0_51, %c0_52] : memref<32x64xf32, #tpu.memory_space<vmem>>, vector<32x64xf32>
    %cst_53 = arith.constant dense<0.000000e+00> : vector<2x64xf32>
    %95 = tpu.matmul %92, %94, %cst_53 {dimension_numbers = #tpu.dot_dimension_numbers<[1], [0], [0], [1], [0, 0, 1, 1], [], []>} : vector<2x32xf32>, vector<32x64xf32>, vector<2x64xf32> -> vector<2x64xf32>
    %c0_54 = arith.constant 0 : index
    %c0_55 = arith.constant 0 : index
    %96 = vector.load %arg16[%c0_54, %c0_55] : memref<32x64xf32, #tpu.memory_space<vmem>>, vector<32x64xf32>
    %cst_56 = arith.constant dense<0.000000e+00> : vector<2x64xf32>
    %97 = tpu.matmul %47, %96, %cst_56 {dimension_numbers = #tpu.dot_dimension_numbers<[1], [0], [0], [1], [0, 0, 1, 1], [], []>} : vector<2x32xf32>, vector<32x64xf32>, vector<2x64xf32> -> vector<2x64xf32>
    %98 = arith.addf %95, %97 : vector<2x64xf32>
    %c0_57 = arith.constant 0 : index
    %c0_58 = arith.constant 0 : index
    %99 = vector.load %arg17[%c0_57, %c0_58] : memref<16x64xf32, #tpu.memory_space<vmem>>, vector<16x64xf32>
    %cst_59 = arith.constant dense<0.000000e+00> : vector<2x64xf32>
    %100 = tpu.matmul %48, %99, %cst_59 {dimension_numbers = #tpu.dot_dimension_numbers<[1], [0], [0], [1], [0, 0, 1, 1], [], []>} : vector<2x16xf32>, vector<16x64xf32>, vector<2x64xf32> -> vector<2x64xf32>
    %101 = arith.addf %98, %100 : vector<2x64xf32>
    %c0_60 = arith.constant 0 : index
    %c0_61 = arith.constant 0 : index
    %102 = vector.load %arg18[%c0_60, %c0_61] : memref<1x64xf32, #tpu.memory_space<vmem>>, vector<1x64xf32>
    %103 = vector.broadcast %102 : vector<1x64xf32> to vector<2x64xf32>
    %104 = arith.addf %101, %103 : vector<2x64xf32>
    %c0_62 = arith.constant 0 : index
    %c0_63 = arith.constant 0 : index
    %105 = vector.load %arg23[%c0_62, %c0_63] : memref<2x64xf32, #tpu.memory_space<vmem>>, vector<2x64xf32>
    tpu.vector_store %arg23[%c0_62, %c0_63], %104 {strides = array<i32>} : memref<2x64xf32, #tpu.memory_space<vmem>>, vector<2x64xf32>,
    %c0_64 = arith.constant 0 : index
    %c0_65 = arith.constant 0 : index
    %106 = vector.load %arg19[%c0_64, %c0_65] : memref<1x32xf32, #tpu.memory_space<vmem>>, vector<1x32xf32>
    %107 = vector.broadcast %106 : vector<1x32xf32> to vector<2x32xf32>
    %108 = arith.mulf %92, %107 : vector<2x32xf32>
    %cst_66 = arith.constant dense<0.000000e+00> : vector<2xf32>
    %109 = vector.multi_reduction <add>, %108, %cst_66 [1] : vector<2x32xf32> to vector<2xf32>
    %110 = vector.shape_cast %109 : vector<2xf32> to vector<2x1xf32>
    %c0_67 = arith.constant 0 : index
    %c0_68 = arith.constant 0 : index
    %111 = vector.load %arg20[%c0_67, %c0_68] : memref<1x32xf32, #tpu.memory_space<vmem>>, vector<1x32xf32>
    %112 = vector.broadcast %111 : vector<1x32xf32> to vector<2x32xf32>
    %113 = arith.mulf %47, %112 : vector<2x32xf32>
    %cst_69 = arith.constant dense<0.000000e+00> : vector<2xf32>
    %114 = vector.multi_reduction <add>, %113, %cst_69 [1] : vector<2x32xf32> to vector<2xf32>
    %115 = vector.shape_cast %114 : vector<2xf32> to vector<2x1xf32>
    %116 = arith.addf %110, %115 : vector<2x1xf32>
    %c0_70 = arith.constant 0 : index
    %c0_71 = arith.constant 0 : index
    %117 = vector.load %arg21[%c0_70, %c0_71] : memref<1x16xf32, #tpu.memory_space<vmem>>, vector<1x16xf32>
    %118 = vector.broadcast %117 : vector<1x16xf32> to vector<2x16xf32>
    %119 = arith.mulf %48, %118 : vector<2x16xf32>
    %cst_72 = arith.constant dense<0.000000e+00> : vector<2xf32>
    %120 = vector.multi_reduction <add>, %119, %cst_72 [1] : vector<2x16xf32> to vector<2xf32>
    %121 = vector.shape_cast %120 : vector<2xf32> to vector<2x1xf32>
    %122 = arith.addf %116, %121 : vector<2x1xf32>
    %c0_73 = arith.constant 0 : index
    %c0_74 = arith.constant 0 : index
    %123 = vector.load %arg22[%c0_73, %c0_74] : memref<1x1xf32, #tpu.memory_space<vmem>>, vector<1x1xf32>
    %124 = vector.broadcast %123 : vector<1x1xf32> to vector<2x1xf32>
    %125 = arith.addf %122, %124 : vector<2x1xf32>
    %cst_75 = arith.constant 5.000000e-01 : f32
    %126 = vector.broadcast %cst_75 : f32 to vector<2x1xf32>
    %127 = arith.mulf %126, %125 : vector<2x1xf32>
    %128 = math.tanh %127 : vector<2x1xf32>
    %cst_76 = arith.constant 5.000000e-01 : f32
    %129 = vector.broadcast %cst_76 : f32 to vector<2x1xf32>
    %130 = arith.mulf %129, %128 : vector<2x1xf32>
    %cst_77 = arith.constant 5.000000e-01 : f32
    %131 = vector.broadcast %cst_77 : f32 to vector<2x1xf32>
    %132 = arith.addf %130, %131 : vector<2x1xf32>
    %c0_78 = arith.constant 0 : index
    %c0_79 = arith.constant 0 : index
    %133 = vector.load %arg26[%c0_78, %c0_79] : memref<2x1xf32, #tpu.memory_space<vmem>>, vector<2x1xf32>
    tpu.vector_store %arg26[%c0_78, %c0_79], %132 {strides = array<i32>} : memref<2x1xf32, #tpu.memory_space<vmem>>, vector<2x1xf32>,
    return
  }
}

</mosaic_0001>

<bundles_post_ra>
// kernel: decoder_forward.1
= control target key start
LH: loop header
LB: loop body
LE: loop exit
PB: predicated region body
PF: predicated region fallthrough
CT: control target
= control target key end

     0   :  { %s1065_s0 = inlined_call_operand.vmem [shape: s32[2,1], index: 0, kind: input, shape index: {}]   ;;  %s1066_s1 = inlined_call_operand.vmem [shape: f32[2,8], index: 1, kind: input, shape index: {}]   ;;  %s1067_s2 = inlined_call_operand.vmem [shape: f32[2,8,32], index: 2, kind: input, shape index: {}]   ;;  %s1068_s3 = inlined_call_operand.vmem [shape: f32[2,16], index: 3, kind: input, shape index: {}]   ;;  %s1069_s4 = inlined_call_operand.vmem [shape: f32[2,32], index: 4, kind: input, shape index: {}]   ;;  %s1070_s5 = inlined_call_operand.vmem [shape: f32[2,32], index: 5, kind: input, shape index: {}]   ;;  %s1071_s6 = inlined_call_operand.vmem [shape: f32[32,32], index: 6, kind: input, shape index: {}]   ;;  %s1072_s7 = inlined_call_operand.vmem [shape: f32[1,32], index: 7, kind: input, shape index: {}]   ;;  %s1073_s8 = inlined_call_operand.vmem [shape: f32[1,32], index: 8, kind: input, shape index: {}]   ;;  %s1074_s9 = inlined_call_operand.<no memory space> [shape: f32[1,1], index: 9, kind: input, shape index: {}]   ;;  %s1075_s10 = inlined_call_operand.vmem [shape: f32[16,96], index: 10, kind: input, shape index: {}]   ;;  %s1076_s11 = inlined_call_operand.vmem [shape: f32[32,96], index: 11, kind: input, shape index: {}]   ;;  %s1077_s12 = inlined_call_operand.vmem [shape: f32[32,96], index: 12, kind: input, shape index: {}]   ;;  %s1078_s13 = inlined_call_operand.vmem [shape: f32[1,96], index: 13, kind: input, shape index: {}]   ;;  %s1079_s14 = inlined_call_operand.vmem [shape: f32[1,96], index: 14, kind: input, shape index: {}]   ;;  %s1080_s15 = inlined_call_operand.vmem [shape: f32[32,64], index: 15, kind: input, shape index: {}]   ;;  %s1081_s16 = inlined_call_operand.vmem [shape: f32[32,64], index: 16, kind: input, shape index: {}]   ;;  %s1082_s17 = inlined_call_operand.vmem [shape: f32[16,64], index: 17, kind: input, shape index: {}]   ;;  %s1083_s18 = inlined_call_operand.vmem [shape: f32[1,64], index: 18, kind: input, shape index: {}]   ;;  %s1084_s19 = inlined_call_operand.vmem [shape: f32[1,32], index: 19, kind: input, shape index: {}]   ;;  %s1085_s20 = inlined_call_operand.vmem [shape: f32[1,32], index: 20, kind: input, shape index: {}]   ;;  %s1086_s21 = inlined_call_operand.vmem [shape: f32[1,16], index: 21, kind: input, shape index: {}]   ;;  %s1087_s23 = inlined_call_operand.hbm [shape: f32[2,64], index: 23, kind: output, shape index: {0}]   ;;  %s1088_s24 = inlined_call_operand.hbm [shape: f32[2,32], index: 24, kind: output, shape index: {1}]   ;;  %s1089_s25 = inlined_call_operand.hbm [shape: f32[2,8], index: 25, kind: output, shape index: {2}]   ;;  %s1090_s26 = inlined_call_operand.vmem [shape: f32[2,1], index: 26, kind: output, shape index: {3}]   ;;  %s1091_s27 = inlined_call_operand.hbm [shape: f32[2,8], index: 27, kind: output, shape index: {4}]   ;;  %s1092_s22 = inlined_call_operand.<no memory space> [shape: f32[1,1], index: 22, kind: input, shape index: {}]  }
   0x1   :  { %1097 = sst [smem:[#allocation14_spill]] %s1065_s0  ;;  %v35_v1 = vstv %s1092_s22 }
   0x2   :  { %1098 = sst [smem:[#allocation15_spill]] %s1066_s1  ;;  %36 = vst [vmem:[#allocation3] sm:$0x1] %v35_v1 }
   0x3   :  { %1099 = sst [smem:[#allocation16_spill]] %s1067_s2 }
   0x4   :  { %1100 = sst [smem:[#allocation17_spill]] %s1068_s3 }
   0x5   :  { %1101 = sst [smem:[#allocation18_spill]] %s1069_s4 }
   0x6   :  { %1102 = sst [smem:[#allocation19_spill]] %s1070_s5 }
   0x7   :  { %1103 = sst [smem:[#allocation20_spill]] %s1071_s6 }
   0x8   :  { %1104 = sst [smem:[#allocation21_spill]] %s1072_s7 }
   0x9   :  { %1105 = sst [smem:[#allocation22_spill]] %s1073_s8 }
   0xa   :  { %1106 = sst [smem:[#allocation23_spill]] %s1074_s9 }
   0xb   :  { %1107 = sst [smem:[#allocation24_spill]] %s1075_s10 }
   0xc   :  { %1108 = sst [smem:[#allocation25_spill]] %s1076_s11 }
   0xd   :  { %s1109_s8 = sld [smem:[#allocation23_spill]] }
  0x13   :  { %v33_v0 = vstv %s1109_s8 }
  0x14   :  { %34 = vst [vmem:[#allocation2] sm:$0x1] %v33_v0 }
  0x15   :  { %37 = vsyncpa [#allocation5], 0 }
  0x16   :  { %38 = vsyncpa [#allocation7], 0  ;;  %s1110_s0 = sld [smem:[#allocation20_spill]]  ;;  %v133_v4 = vlaneseq  ;;  %vm93_vm0 = vcmask 261120  }
  0x17   :  { %s1111_s11 = sld [smem:[#allocation16_spill]] }
  0x18   :  { %v134_v6 = vshrl.u32 %v133_v4, 7  ;;  %s1112_s5 = sld [smem:[#allocation15_spill]] }
  0x1a   :  { %609 = vset.pattern.permute.xlu0 %v134_v6 }
  0x1c   :  { %v92_v2 = vld [vmem:[%s1110_s0 + $0x18] sm:$0xff]  ;;  %v91_v3 = vld [vmem:[%s1110_s0 + $0x10] sm:$0xff]  ;;  %v90_v7 = vld [vmem:[%s1110_s0 + $0x8] sm:$0xff] }
  0x1d   :  { %112 = vmatpush.msra.mxu0 %v92_v2  ;;  %v86_v5 = vld [vmem:[%s1111_s11] sm:$0xff]  ;;  %v87_v9 = vld [vmem:[%s1111_s11 + $0x8] sm:$0xff] }
  0x1e   :  { %v89_v8 = vld [vmem:[%s1110_s0] sm:$0xff]  ;;  %240 = vmatpush.msra.mxu1 %v86_v5  ;;  %262 = vmatpush.msra.mxu2 %v87_v9 }
  0x1f   :  { %113 = vmatpush.msra.mxu0 %v91_v3  ;;  %v913_v10 = vld [vmem:[%s1112_s5] sm:$0x3] }
  0x21   :  { %114 = vmatpush.msra.mxu0 %v90_v7 }
  0x22   :  { %39 = vsyncpa [#allocation10], 0  ;;  %v132_v11 = vperm.slane %v913_v10, 0  ;;  %v139_v12 = vperm.slane %v913_v10, 1  ;;  %v614_v13 = vld [vmem:[#allocation2] ss:$0 sm:$0xff] }
  0x23   :  { %115 = vmatpush.msra.mxu0 %v89_v8  ;;  %v738_v14 = vmov 0   ;;  %s1113_s10 = sld [smem:[#allocation19_spill]]  ;;  %v178_v40 = vand.u32 127, %v133_v4  ;;  %vm188_vm1 = vcmask 1041409   ;;  %vm192_vm2 = vcmask 58368   ;;  %v333_v55 = vld [vmem:[%s1077_s12 + $0x18] sm:$0xff] }
  0x24   :  { %591 = vmatmul.msk.f32.vlgmr.msra.gmra.mxu0 %vm93_vm0, %v86_v5  ;;  %137 = vperm.xlu0 %609, %v132_v11   ;;  %s1114_s6 = sld [smem:[#allocation21_spill]]  ;;  %v332_v56 = vld [vmem:[%s1077_s12 + $0x10] sm:$0xff]  ;;  %v331_v57 = vld [vmem:[%s1077_s12 + $0x8] sm:$0xff]  ;;  %v330_v58 = vld [vmem:[%s1077_s12] sm:$0xff]  ;;  %vm222_vm8 = vcmask 64512   ;;  %vm301_vm9 = vcmask 130048  }
  0x25   :  { %610 = vset.pattern.permute.xlu2 %v738_v14  ;;  %s1115_s2 = sld [smem:[#allocation14_spill]]  ;;  %353 = vmatpush.msrb.mxu2 %v333_v55  ;;  %v618_v55 = vld [vmem:[%s1084_s19] ss:$0 sm:$0xff]  ;;  %vm392_vm10 = vcmask 254976   ;;  %vm508_vm11 = vcmask 123904   ;;  %vm472_vm12 = vcmask 517120  }
  0x26   :  { %172 = vperm.xlu2 %610, %v614_v13   ;;  %s1116_s4 = sld [smem:[#allocation22_spill]]  ;;  %s531_s12 = sshll.u32 %s1087_s23, 4  ;;  %vm522_vm13 = vcmask 1024   ;;  %s532_s12 = int_to_ptr.hbm [resolvable:$true] %s531_s12 }
  0x27   :  { %354 = vmatpush.msrb.mxu2 %v332_v56  ;;  %s1119_s0 = sld [smem:[#allocation24_spill]]  ;;  %s743_s1 = smov [#allocation4]  }
  0x28   :  { %s1120_s3 = sld [smem:[#allocation17_spill]]  ;;  %s745_s8 = smov [#allocation9]  }
  0x29   :  { %v123_v15 = vld [vmem:[%s1113_s10] sm:$0x3]  ;;  %355 = vmatpush.msrb.mxu2 %v331_v57  ;;  %s564_s23 = sshll.u32 %s745_s8, 4  ;;  %s565_s23 = int_to_ptr.vmem [resolvable:$true] %s564_s23 }
  0x2a   :  { %v612_v16 = vld [vmem:[%s1114_s6] ss:$0 sm:$0xff]  ;;  %v126_v18 = vperm.slane %v123_v15, 0  ;;  %v125_v23 = vrot.slane %v123_v15, 1  ;;  %s1117_s6 = sld [smem:[#allocation18_spill]]  ;;  %v401_v15 = vld [vmem:[%s1081_s16 + $0x18] sm:$0xff] }
  0x2b   :  { %v179_v19 = vld [vmem:[%s1115_s2] sm:$0x3]  ;;  %356 = vmatpush.msrb.mxu2 %v330_v58  ;;  %s1118_s2 = sld [smem:[#allocation25_spill]] }
  0x2c   :  { %592 = vmatmul.msk.f32.gmra.mxu0 %vm93_vm0, %v87_v9  ;;  %144 = vperm.xlu0 %609, %v139_v12   ;;  %v127_v25 = vperm.slane %v125_v23, 0  ;;  %v613_v28 = vld [vmem:[%s1116_s4] ss:$0 sm:$0xff]  ;;  %s566_s4 = sshll.u32 %s1091_s27, 4  ;;  %s567_s4 = int_to_ptr.hbm [resolvable:$true] %s566_s4 }
  0x2e   :  { %181 = vperm.xlu2 %610, %v179_v19   ;;  %v399_v19 = vld [vmem:[%s1081_s16 + $0x8] sm:$0xff] }
  0x30   :  { %v268_v9 = vld [vmem:[%s1117_s6] sm:$0x3]  ;;  %s529_s6 = sshll.u32 %s743_s1, 4  ;;  %s530_s6 = int_to_ptr.vmem [resolvable:$true] %s529_s6 }
  0x31   :  { %v274_v11 = vld [vmem:[%s1118_s2 + $0x18] sm:$0xff]  ;;  %v273_v12 = vld [vmem:[%s1118_s2 + $0x10] sm:$0xff]  ;;  %v271_v13 = vld [vmem:[%s1118_s2] sm:$0xff] }
  0x32   :  { %293 = vmatpush.msra.mxu3 %v274_v11  ;;  %v619_v11 = vld [vmem:[%s1083_s18] ss:$0 sm:$0xff]  ;;  %s744_s18 = smov [#allocation8]  }
  0x33   :  { %s551_s11 = sshll.u32 %s744_s18, 4  ;;  %s552_s11 = int_to_ptr.vmem [resolvable:$true] %s551_s11 }
  0x34   :  { %611 = vset.pattern.permute.xlu0 %v738_v14  ;;  %294 = vmatpush.msra.mxu3 %v273_v12  ;;  %v270_v14 = vld [vmem:[%s1119_s0 + $0x8] sm:$0xff] }
  0x35   :  { %319 = vmatpush.msrb.mxu1 %v270_v14 }
  0x80   :  { %v173_v38 = vpop.permute.xlu2 %172 }
  0x88   :  { %v182_v44 = vpop.permute.xlu2 %181 }
  0x89   :  { %vm183_vm3 = vcmp.ge.s32.totalorder %v178_v40, %v182_v44  ;;  %v445_v44 = vld [vmem:[%s1082_s17 + $0x8] sm:$0xff] }
  0x96   :  { %v138_v17 = vpop.permute.xlu0 %137 }
  0x97   :  { %v150_v20 = vmul.f32 %v612_v16, %v138_v17  ;;  %v400_v17 = vld [vmem:[%s1081_s16 + $0x10] sm:$0xff] }
  0x9e   :  { %v145_v26 = vpop.permute.xlu0 %144 }
  0x9f   :  { %v151_v29 = vmul.f32 %v612_v16, %v145_v26  ;;  %v269_v16 = vld [vmem:[%s1119_s0] sm:$0xff] }
  0xa0   :  { %320 = vmatpush.msrb.mxu1 %v269_v16 }
  0xa1   :  { %v117_v21 = vpop.f32.mrf.mxu0 }
  0xa2   :  { %v130_v22 = vadd.f32 %v126_v18, %v117_v21  ;;  %v982_v18 = vld [vmem:[%s1120_s3] sm:$0x3]  ;;  %s553_s3 = sshll.u32 %s1089_s25, 4  ;;  %s554_s3 = int_to_ptr.hbm [resolvable:$true] %s553_s3 }
  0xa4   :  { %v152_v24 = vadd.f32 %v150_v20, %v130_v22  ;;  %v398_v20 = vld [vmem:[%s1081_s16] sm:$0xff]  ;;  %s739_s16 = smov 64  }
  0xa6   :  { %622 = vtanh.f32 %v152_v24 }
  0xa9   :  { %v120_v27 = vpop.f32.mrf.mxu0 }
  0xaa   :  { %v131_v30 = vadd.f32 %v127_v25, %v120_v27  ;;  %v616_v25 = vld [vmem:[%s1079_s14] ss:$0 sm:$0xff]  ;;  %s740_s14 = smov 96  }
  0xac   :  { %v623_v31 = vpop.eup %622  ;;  %v153_v32 = vadd.f32 %v151_v29, %v131_v30  ;;  %v617_v29 = vld [vmem:[%s1078_s13] ss:$0 sm:$0xff]  ;;  %s741_s13 = smov 32  }
  0xad   :  { %v160_v33 = vmul.f32 %v623_v31, %v613_v28 }
  0xae   :  { %624 = vtanh.f32 %v153_v32 }
  0xaf   :  { %v162_v34 = vsel %vm93_vm0, %v160_v33, 0.0 }
  0xb0   :  { %163 = vadd.xlane.f32.xlu1 %v162_v34 }
  0xb4   :  { %v625_v35 = vpop.eup %624 }
  0xb5   :  { %v161_v36 = vmul.f32 %v625_v35, %v613_v28 }
  0xb7   :  { %v165_v37 = vsel %vm93_vm0, %v161_v36, 0.0 }
  0xb8   :  { %166 = vadd.xlane.f32.xlu1 %v165_v37 }
 0x123   :  { %v164_v39 = vpop.xlane.xlu1 %163 }
 0x124   :  { %v175_v41 = vadd.f32 %v173_v38, %v164_v39 }
 0x126   :  { %v186_v45 = vperm.slane %v175_v41, %v178_v40 }
 0x12b   :  { %v167_v42 = vpop.xlane.xlu1 %166 }
 0x12c   :  { %v176_v43 = vadd.f32 %v173_v38, %v167_v42 }
 0x12e   :  { %v187_v46 = vperm.slane %v176_v43, %v178_v40  ;;  %v397_v43 = vld [vmem:[%s1080_s15 + $0x18] sm:$0xff] }
 0x130   :  { %v189_v47 = vsel %vm188_vm1, %v187_v46, %v186_v45  ;;  %v396_v45 = vld [vmem:[%s1080_s15 + $0x10] sm:$0xff]  ;;  %v444_v46 = vld [vmem:[%s1082_s17] sm:$0xff] }
 0x131   :  { %v191_v48 = vsel %vm183_vm3, -1e+30, %v189_v47  ;;  %v395_v47 = vld [vmem:[%s1080_s15 + $0x8] sm:$0xff] }
 0x132   :  { %v193_v49 = vsel %vm192_vm2, %v191_v48, -inf }
 0x133   :  { %194 = vmax.xlane.f32.xlu0 %v193_v49 }
 0x1a6   :  { %v195_v50 = vpop.xlane.xlu0 %194 }
 0x1a7   :  { %v196_v51 = vsub.f32 %v191_v48, %v195_v50  ;;  %v394_v48 = vld [vmem:[%s1080_s15] sm:$0xff] }
 0x1a9   :  { %v197_v52 = vmul.f32 1.442695, %v196_v51 }
 0x1ab   :  { %626 = vpow2.f32 %v197_v52 }
 0x1b1   :  { %v627_v53 = vpop.eup %626 }
 0x1b2   :  { %v199_v54 = vsel %vm192_vm2, %v627_v53, 0.0 }
 0x1b3   :  { %200 = vadd.xlane.f32.xlu1 %v199_v54 }
 0x226   :  { %v201_v59 = vpop.xlane.xlu1 %200 }
 0x227   :  { %628 = vrcp.f32 %v201_v59  ;;  %v213_v63 = vand.u32 2147483648, %v201_v59  ;;  %v211_v1 = vand.u32 2147483647, %v201_v59  ;;  %vm207_vm5 = vweird.f32 %v201_v59 }
 0x229   :  { %v214_v3 = vor.u32 1.1754944e-38, %v213_v63  ;;  %vm212_vm7 = vcmp.eq.f32.partialorder %v211_v1, 8.507059e+37  ;;  %v620_v1 = vld [vmem:[%s1086_s21] ss:$0 sm:$0xff]  ;;  %s742_s21 = smov [#allocation6]  }
 0x22a   :  { %s540_s28 = sshll.u32 %s742_s21, 4  ;;  %s541_s28 = int_to_ptr.vmem [resolvable:$true] %s540_s28 }
 0x22d   :  { %v629_v60 = vpop.eup %628 }
 0x22e   :  { %v203_v61 = vmul.f32 %v629_v60, %v201_v59  ;;  %vm208_vm4 = vweird.f32 %v629_v60  ;;  %v615_v59 = vld [vmem:[%s1085_s20] ss:$0 sm:$0xff] }
 0x22f   :  { %vm209_vm6 = vmor %vm207_vm5, %vm208_vm4 }
 0x230   :  { %v204_v62 = vsub.f32 1.0, %v203_v61 }
 0x232   :  { %v205_v0 = vmul.f32 %v629_v60, %v204_v62 }
 0x234   :  { %v206_v2 = vadd.f32 %v629_v60, %v205_v0 }
 0x236   :  { %v210_v4 = vsel %vm209_vm6, %v629_v60, %v206_v2  ;;  %v507_v2 = vmul.f32 %v620_v1, %v982_v18 }
 0x237   :  { %v215_v5 = vsel %vm212_vm7, %v214_v3, %v210_v4 }
 0x238   :  { %v216_v6 = vmul.f32 %v627_v53, %v215_v5  ;;  %v509_v3 = vsel %vm508_vm11, %v507_v2, 0.0 }
 0x239   :  { %510 = vadd.xlane.f32.xlu0 %v509_v3 }
 0x23a   :  { %593 = vmatmul.msk.f32.vlgmr.msra.gmra.mxu1 %vm222_vm8, %v216_v6  ;;  %217 = vst.msk [vmem:[#allocation8] sm:$0x3] %vm192_vm2, %v216_v6  ;;  %v221_v7 = vrot.slane %v216_v6, 1  ;;  %v218_v8 = vadd.f32 %v216_v6, %v913_v10  ;;  %v272_v10 = vld [vmem:[%s1118_s2 + $0x8] sm:$0xff] }
 0x23b   :  { %295 = vmatpush.msra.mxu3 %v272_v10  ;;  %436 = vmatpush.msra.mxu1 %v397_v43 }
 0x23c   :  { %594 = vmatmul.msk.f32.vlgmr.msra.gmra.mxu2 %vm222_vm8, %v221_v7  ;;  %219 = vst.msk [vmem:[#allocation9] sm:$0x3] %vm192_vm2, %v218_v8 }
 0x23d   :  { %296 = vmatpush.msra.mxu3 %v271_v13  ;;  %460 = vmatpush.msra.mxu2 %v445_v44  ;;  %569 = dma.vmem_to_hbm [thread:$0]  %s565_s23, 32, %s567_s4, [#allocation10]  }
 0x23e   :  { %437 = vmatpush.msra.mxu1 %v396_v45 }
 0x23f   :  { %414 = vmatpush.msrb.mxu3 %v401_v15  ;;  %461 = vmatpush.msra.mxu2 %v444_v46 }
 0x240   :  { %438 = vmatpush.msra.mxu1 %v395_v47 }
 0x241   :  { %415 = vmatpush.msrb.mxu3 %v400_v17  ;;  %v621_v17 = vld [vmem:[#allocation3] ss:$0 sm:$0xff] }
 0x242   :  { %596 = vmatmul.msk.f32.vlgmr.msrb.gmra.mxu1 %vm301_vm9, %v982_v18 }
 0x243   :  { %416 = vmatpush.msrb.mxu3 %v399_v19  ;;  %439 = vmatpush.msra.mxu1 %v394_v48 }
 0x244   :  { %597 = vmatmul.msk.f32.vlgmr.msrb.gmra.mxu2 %vm93_vm0, %v268_v9 }
 0x245   :  { %417 = vmatpush.msrb.mxu3 %v398_v20 }
 0x24c   :  { %600 = vmatmul.msk.f32.vlgmr.msra.gmra.mxu2 %vm301_vm9, %v982_v18 }
 0x2ac   :  { %v511_v15 = vpop.xlane.xlu0 %510 }
 0x2b7   :  { %v995_v23 = vpop.f32.mrf.mxu1 }
 0x2b8   :  { %v492_v62 = vmul.f32 %v615_v59, %v995_v23 }
 0x2bf   :  { %v992_v21 = vpop.f32.mrf.mxu2  ;;  %v322_v28 = vpop.f32.mrf.mxu1 }
 0x2c0   :  { %v277_v22 = vrot.slane %v992_v21, 7  ;;  %v493_v60 = vmul.f32 %v615_v59, %v992_v21 }
 0x2c2   :  { %v278_v24 = vsel %vm188_vm1, %v277_v22, %v995_v23  ;;  %v496_v61 = vrot.slane %v493_v60, 7 }
 0x2c3   :  { %595 = vmatmul.msk.f32.vlgmr.msra.gmra.mxu3 %vm93_vm0, %v278_v24 }
 0x2c4   :  { %v497_v63 = vsel %vm188_vm1, %v496_v61, %v492_v62 }
 0x2c5   :  { %v499_v0 = vsel %vm392_vm10, %v497_v63, 0.0 }
 0x2c7   :  { %v358_v26 = vpop.f32.mrf.mxu2 }
 0x2c8   :  { %v359_v27 = vadd.f32 %v616_v25, %v358_v26 }
 0x2ca   :  { %367 = vrot.lane.b32.xlu2 %v359_v27, %s739_s16 }
 0x2cb   :  { %598 = vmatmul.msk.f32.vlgmr.msrb.gmra.mxu3 %vm93_vm0, %v278_v24 }
 0x2cf   :  { %v463_v8 = vpop.f32.mrf.mxu2 }
 0x324   :  { %v368_v37 = vpop.permute.xlu2 %367 }
 0x346   :  { %v298_v30 = vpop.f32.mrf.mxu3 }
 0x347   :  { %v323_v31 = vadd.f32 %v322_v28, %v298_v30 }
 0x349   :  { %v329_v32 = vadd.f32 %v617_v29, %v323_v31 }
 0x34b   :  { %v361_v33 = vadd.f32 %v359_v27, %v329_v32 }
 0x34d   :  { %v362_v34 = vmul.f32 0.5, %v361_v33 }
 0x34e   :  { %v419_v4 = vpop.f32.mrf.mxu3 }
 0x34f   :  { %630 = vtanh.f32 %v362_v34 }
 0x355   :  { %v631_v35 = vpop.eup %630 }
 0x356   :  { %v364_v36 = vmul.f32 0.5, %v631_v35 }
 0x358   :  { %v365_v38 = vadd.f32 0.5, %v364_v36 }
 0x35a   :  { %v370_v39 = vmul.f32 %v368_v37, %v365_v38  ;;  %v377_v50 = vsub.f32 1.0, %v365_v38 }
 0x35c   :  { %372 = vrot.lane.b32.xlu1 %v370_v39, %s739_s16 }
 0x3ce   :  { %v373_v40 = vpop.permute.xlu1 %372 }
 0x3cf   :  { %v375_v41 = vadd.f32 %v373_v40, %v329_v32 }
 0x3d1   :  { %632 = vtanh.f32 %v375_v41 }
 0x3d7   :  { %v633_v42 = vpop.eup %632 }
 0x3d8   :  { %379 = vrot.lane.b32.xlu2 %v633_v42, %s740_s14 }
 0x3e0   :  { %383 = vrot.lane.b32.xlu2 %v268_v9, %s741_s13 }
 0x432   :  { %v380_v49 = vpop.permute.xlu2 %379 }
 0x433   :  { %v382_v52 = vmul.f32 %v380_v49, %v377_v50 }
 0x43a   :  { %v384_v51 = vpop.permute.xlu2 %383 }
 0x43b   :  { %v386_v53 = vmul.f32 %v384_v51, %v365_v38 }
 0x43d   :  { %v387_v54 = vadd.f32 %v386_v53, %v382_v52 }
 0x43f   :  { %389 = vrot.lane.b32.xlu2 %v387_v54, %s740_s14 }
 0x447   :  { %477 = vrot.lane.b32.xlu2 %v618_v55, %s741_s13  ;;  %s542_s13 = sshll.u32 %s1088_s24, 4  ;;  %s543_s13 = int_to_ptr.hbm [resolvable:$true] %s542_s13 }
 0x499   :  { %v390_v56 = vpop.permute.xlu2 %389 }
 0x49a   :  { %599 = vmatmul.msk.f32.vlgmr.msra.gmra.mxu1 %vm93_vm0, %v390_v56  ;;  %393 = vst.msk [vmem:[#allocation6] sm:$0x3] %vm392_vm10, %v390_v56 }
 0x49b   :  { %545 = dma.vmem_to_hbm [thread:$0]  %s541_s28, 32, %s543_s13, [#allocation7]  }
 0x49c   :  { %556 = dma.vmem_to_hbm [thread:$0]  %s552_s11, 32, %s554_s3, [#allocation7]  }
 0x4a1   :  { %v478_v57 = vpop.permute.xlu2 %477 }
 0x4a2   :  { %v480_v58 = vmul.f32 %v478_v57, %v387_v54 }
 0x4a4   :  { %482 = vrot.lane.b32.xlu1 %v480_v58, %s740_s14 }
 0x4ce   :  { %500 = vadd.xlane.f32.xlu1 %v499_v0 }
 0x516   :  { %v483_v5 = vpop.permute.xlu1 %482 }
 0x517   :  { %v441_v6 = vpop.f32.mrf.mxu1  ;;  %v485_v7 = vsel %vm392_vm10, %v483_v5, 0.0 }
 0x518   :  { %v442_v9 = vadd.f32 %v441_v6, %v419_v4  ;;  %486 = vadd.xlane.f32.xlu2 %v485_v7 }
 0x51a   :  { %v466_v12 = vadd.f32 %v463_v8, %v442_v9 }
 0x51c   :  { %v471_v10 = vadd.f32 %v619_v11, %v466_v12 }
 0x51e   :  { %473 = vst.msk [vmem:[#allocation4] sm:$0x3] %vm472_vm12, %v471_v10 }
 0x51f   :  { %534 = dma.vmem_to_hbm [thread:$0]  %s530_s6, 32, %s532_s12, [#allocation5]  }
 0x541   :  { %v501_v13 = vpop.xlane.xlu1 %500 }
 0x58b   :  { %v487_v14 = vpop.xlane.xlu2 %486 }
 0x58c   :  { %v502_v16 = vadd.f32 %v501_v13, %v487_v14 }
 0x58e   :  { %v512_v18 = vadd.f32 %v511_v15, %v502_v16 }
 0x590   :  { %v517_v19 = vadd.f32 %v621_v17, %v512_v18 }
 0x592   :  { %v518_v20 = vmul.f32 0.5, %v517_v19 }
 0x594   :  { %634 = vtanh.f32 %v518_v20 }
 0x59a   :  { %v635_v21 = vpop.eup %634 }
 0x59b   :  { %v520_v22 = vmul.f32 0.5, %v635_v21 }
 0x59d   :  { %v521_v23 = vadd.f32 0.5, %v520_v22 }
 0x59f   :  { %523 = vst.msk [vmem:[%s1090_s26] sm:$0x3] %vm522_vm13, %v521_v23 }
 0x5a0   :  { %732 = dma.done.wait [#allocation5], 32  }
 0x5a1   :  { %733 = vsyncadd [#allocation5], 4294967264 }
 0x5a2   :  { %734 = dma.done.wait [#allocation7], 64  }
 0x5a3   :  { %735 = vsyncadd [#allocation7], 4294967232 }
 0x5a4   :  { %736 = dma.done.wait [#allocation10], 32  }
 0x5a5   :  { %737 = vsyncadd [#allocation10], 4294967264 }
 0x5a6   :  { %588 = vsyncpa [#allocation5], 1 }
 0x5a7   :  { %589 = vsyncpa [#allocation7], 1 }
 0x5a8   :  { %590 = vsyncpa [#allocation10], 1 }

</bundles_post_ra>
